<compile_context>
chip_gen: v6e
topology: v6e:2x2x1
jax: 0.10.0
libtpu: 0.0.40
codegen_flags: <defaults>
</compile_context>

<pallas_src>
import math

import jax
import jax.numpy as jnp
from jax.experimental import pallas as pl
from jax.experimental.pallas import tpu as pltpu

_LANES = 128


def _drop_path_kernel(scale_ref, x_ref, o_ref):
    # scale_ref: (TB, 1) in x.dtype; x_ref / o_ref: (TB, TF).
    # Pure VPU broadcast multiply -- stays at the HBM roofline.
    o_ref[...] = (x_ref[...] * scale_ref[...]).astype(o_ref.dtype)


def _drop_path_residual_kernel(scale_ref, x_ref, res_ref, o_ref):
    # Fused `residual + drop_path(x)` -- saves one full-tensor HBM round trip.
    o_ref[...] = (res_ref[...] + x_ref[...] * scale_ref[...]).astype(o_ref.dtype)


def _device_block_bytes():
    """Generation-aware block-byte target for this pure HBM-streaming op."""
    try:
        kind = jax.devices()[0].device_kind.lower()
    except Exception:
        kind = ""
    if "v7" in kind:
        return 4 << 20, True    # faster HBM -> bigger blocks; 2 TCs per chip
    if "v6" in kind:
        return 4 << 20, False   # 32 MiB scoped default covers 4 x 4 MiB buffers
    return 2 << 20, False       # v5e (16 MiB scoped default) and unknown chips


def _choose_tiles(B, F, itemsize, block_bytes):
    """Pick a ~block_bytes (TB, TF) block with a wide lane-dense last dim."""
    sub = max(8, 32 // itemsize)          # sublane multiple: 8 f32 / 16 bf16 / 32 i8
    elems_target = max(sub * _LANES, block_bytes // itemsize)
    if F * min(B, sub) * itemsize <= block_bytes:
        # Whole rows fit in the budget: take the full feature axis (legal even
        # if ragged) and pack several batch samples per block.
        tf = F
        tb = max(1, elems_target // max(F, 1))
        if tb >= B:
            tb = B
        else:
            tb = min(B, max(sub, (tb // sub) * sub))
    else:
        # Large rows: tile the feature axis with a wide multiple of 128 lanes;
        # Pallas masks the ragged last column block (no jnp.pad round trip).
        tb = B if B <= sub else sub
        tf = max(_LANES, (elems_target // tb) // _LANES * _LANES)
        tf = min(tf, pl.cdiv(F, _LANES) * _LANES)
    return tb, tf


def drop_path(x, drop_prob: float = 0.0, training: bool = False,
              scale_by_keep: bool = True, *, key=None, seed: int = 0,
              residual=None):
    """Pallas implementation of per-sample stochastic depth (forward).

    If `residual` is given, returns the fused `residual + drop_path(x)`.
    """
    if drop_prob == 0.0 or not training:
        return x if residual is None else x + residual
    keep_prob = 1.0 - drop_prob

    if key is None:
        key = jax.random.PRNGKey(seed)

    B = x.shape[0]
    F = int(math.prod(x.shape[1:]))

    # Per-sample bernoulli scales (B,), drawn once in plain JAX, cast to
    # x.dtype (matches torch: mask built in x.dtype, divided in-place).
    keep = jax.random.bernoulli(key, p=keep_prob, shape=(B,))
    scale_val = (1.0 / keep_prob) if (scale_by_keep and keep_prob > 0.0) else 1.0
    scale2 = (keep.astype(jnp.float32) * jnp.float32(scale_val)).astype(x.dtype)
    scale2 = scale2.reshape(B, 1)

    # Wide lane-dense 2-D view (B, F); no padding copy for ragged F.
    x2 = x.reshape(B, F)
    res2 = residual.astype(x.dtype).reshape(B, F) if residual is not None else None

    block_bytes, is_v7x = _device_block_bytes()
    tb, tf = _choose_tiles(B, F, x.dtype.itemsize, block_bytes)
    grid = (pl.cdiv(B, tb), pl.cdiv(F, tf))
    if is_v7x and grid == (1, 1) and F >= 2 * _LANES:
        # Keep both v7x TensorCores streaming: split the lane axis in two.
        tf = pl.cdiv(pl.cdiv(F, 2), _LANES) * _LANES
        grid = (pl.cdiv(B, tb), pl.cdiv(F, tf))

    # Explicit scoped-VMEM budget: double-buffered in/out (+ residual) blocks.
    n_big_bufs = 4 + (2 if residual is not None else 0)
    working = n_big_bufs * tb * tf * x.dtype.itemsize
    vmem_limit = int(min(32 << 20, max(2 * working, 16 << 20)))

    x_spec = pl.BlockSpec((tb, tf), lambda bi, fi: (bi, fi))
    in_specs = [pl.BlockSpec((tb, 1), lambda bi, fi: (bi, 0)),  # per-sample scale
                x_spec]                                          # x tile
    args = [scale2, x2]
    kernel = _drop_path_kernel
    if res2 is not None:
        in_specs.append(x_spec)
        args.append(res2)
        kernel = _drop_path_residual_kernel

    out2 = pl.pallas_call(
        kernel,
        out_shape=jax.ShapeDtypeStruct((B, F), x.dtype),
        grid=grid,
        in_specs=in_specs,
        out_specs=x_spec,
        compiler_params=pltpu.CompilerParams(
            # No cross-iteration dependence: shard both axes across TCs (v7x).
            dimension_semantics=("parallel", "parallel"),
            vmem_limit_bytes=vmem_limit,
        ),
    )(*args)

    return out2.reshape(x.shape)


class DropPath:
    """Drop paths (Stochastic Depth) per sample -- Pallas/TPU version."""

    def __init__(self, drop_prob: float = 0.0, scale_by_keep: bool = True):
        self.drop_prob = float(drop_prob)
        self.scale_by_keep = bool(scale_by_keep)
        self.training = True   # no parameters; only a training flag
        self._calls = 0        # folded into default seed so repeated calls differ

    def __call__(self, x, key=None, seed: int = 0, residual=None):
        if key is None:
            key = jax.random.PRNGKey(seed + self._calls)
            self._calls += 1
        return drop_path(x, self.drop_prob, self.training, self.scale_by_keep,
                         key=key, residual=residual)

    def extra_repr(self):
        return f"drop_prob={round(self.drop_prob, 3):0.3f}"


if __name__ == "__main__":
    root = jax.random.PRNGKey(0)
    kx, kres, kmask = jax.random.split(root, 3)
    x = jax.random.normal(kx, (2, 4, 16, 16), dtype=jnp.float32)

    # --- eval mode: identity ---
    mod_eval = DropPath(drop_prob=0.25)
    mod_eval.training = False
    y_eval = jax.block_until_ready(mod_eval(x))
    assert jnp.allclose(y_eval, x), "eval mode must be identity"

    # --- train mode: per-sample mask in {0, 1/keep_prob} ---
    mod = DropPath(drop_prob=0.25, scale_by_keep=True)
    mod.training = True
    y = jax.block_until_ready(mod(x, key=kmask))
    keep_prob = 1.0 - mod.drop_prob
    for b in range(x.shape[0]):
        xb, yb = x[b], y[b]
        kept = bool(jnp.allclose(yb, xb / keep_prob, atol=1e-5))
        dropped = bool(jnp.allclose(yb, jnp.zeros_like(yb)))
        assert kept or dropped, f"sample {b}: invalid per-sample scaling"

    # --- ragged feature count (F % 128 != 0) + bf16, no pad fallback ---
    xr = jax.random.normal(kx, (4, 5, 7, 9), dtype=jnp.bfloat16)
    yr = jax.block_until_ready(drop_path(xr, 0.25, True, True, key=kmask))
    for b in range(xr.shape[0]):
        yb = yr[b].astype(jnp.float32)
        xb = xr[b].astype(jnp.float32)
        kept = bool(jnp.allclose(yb, xb / 0.75, rtol=5e-2, atol=5e-2))
        dropped = bool(jnp.allclose(yb, jnp.zeros_like(yb)))
        assert kept or dropped, f"ragged sample {b}: invalid per-sample scaling"

    # --- fused residual variant: out == residual + drop_path(x) ---
    res = jax.random.normal(kres, x.shape, dtype=jnp.float32)
    y_plain = drop_path(x, 0.25, True, True, key=kmask)
    y_fused = jax.block_until_ready(
        drop_path(x, 0.25, True, True, key=kmask, residual=res))
    assert jnp.allclose(y_fused, y_plain + res, atol=1e-5), "fused residual mismatch"

    print("KERNEL_OK")
</pallas_src>

<mosaic_0001>
module attributes {stable_mosaic.version = 11 : i64} {
  func.func @_drop_path_kernel(%arg0: i32, %arg1: i32, %arg2: memref<2x1xf32, #tpu.memory_space<vmem>>, %arg3: memref<2x1024xf32, #tpu.memory_space<vmem>>, %arg4: memref<2x1024xf32, #tpu.memory_space<vmem>>) attributes {dimension_semantics = [#tpu.dimension_semantics<parallel>, #tpu.dimension_semantics<parallel>], iteration_bounds = array<i64: 1, 1>, scalar_prefetch = 0 : i64, scratch_operands = 0 : i64, tpu.core_type = #tpu.core_type<tc>, window_params = [{transform_indices = @transform_0, window_bounds = array<i64: 2, 1>}, {transform_indices = @transform_1, window_bounds = array<i64: 2, 1024>}, {transform_indices = @transform_2, window_bounds = array<i64: 2, 1024>}]} {
    %c0 = arith.constant 0 : index
    %c0_0 = arith.constant 0 : index
    %0 = vector.load %arg3[%c0, %c0_0] : memref<2x1024xf32, #tpu.memory_space<vmem>>, vector<2x1024xf32>
    %c0_1 = arith.constant 0 : index
    %c0_2 = arith.constant 0 : index
    %1 = vector.load %arg2[%c0_1, %c0_2] : memref<2x1xf32, #tpu.memory_space<vmem>>, vector<2x1xf32>
    %2 = vector.broadcast %1 : vector<2x1xf32> to vector<2x1024xf32>
    %3 = arith.mulf %0, %2 : vector<2x1024xf32>
    %c0_3 = arith.constant 0 : index
    %c0_4 = arith.constant 0 : index
    %4 = vector.load %arg4[%c0_3, %c0_4] : memref<2x1024xf32, #tpu.memory_space<vmem>>, vector<2x1024xf32>
    tpu.vector_store %arg4[%c0_3, %c0_4], %3 {strides = array<i32>} : memref<2x1024xf32, #tpu.memory_space<vmem>>, vector<2x1024xf32>,
    return
  }
  func.func @transform_0(%arg0: i32, %arg1: i32) -> (i32, i32) {
    %c0_i32 = arith.constant 0 : i32
    %c0_i32_0 = arith.constant 0 : i32
    return %arg0, %c0_i32 : i32, i32
  }
  func.func @transform_1(%arg0: i32, %arg1: i32) -> (i32, i32) {
    %c0_i32 = arith.constant 0 : i32
    return %arg0, %arg1 : i32, i32
  }
  func.func @transform_2(%arg0: i32, %arg1: i32) -> (i32, i32) {
    %c0_i32 = arith.constant 0 : i32
    return %arg0, %arg1 : i32, i32
  }
}

</mosaic_0001>

<bundles_post_ra>
// kernel: tpu_custom_call.1
= control target key start
LH: loop header
LB: loop body
LE: loop exit
PB: predicated region body
PF: predicated region fallthrough
CT: control target
= control target key end

     0   :  { %7 = vsyncpa [#allocation3], 0  ;;  %s135_s0 = inlined_call_operand.vmem [shape: f32[2,1], index: 0, kind: input, shape index: {}]   ;;  %s136_s1 = inlined_call_operand.hbm [shape: f32[2,1024], index: 1, kind: input, shape index: {}]   ;;  %s137_s2 = inlined_call_operand.hbm [shape: f32[2,1024], index: 2, kind: output, shape index: {}]  }
   0x1   :  { %8 = vsyncpa [#allocation4], 0  ;;  %s107_s9 = smov [#allocation2]  }
   0x2   :  { %s17_s10 = sshll.u32 %s107_s9, 4  ;;  %s18_s10 = int_to_ptr.vmem [resolvable:$true] %s17_s10 }
   0x3   :  { %s71_s11 = scalar_lea.vmem %s18_s10, 256  ;;  %p76_p1 = scmp.lt.s32.totalorder %s18_s10, %s18_s10 }
   0x4   :  { %p72_p0 = scmp.ne.s32.totalorder %s18_s10, %s71_s11  ;;  %p77_p2 = scmp.lt.s32.totalorder %s71_s11, %s71_s11 }
   0x6   :  { %p78_p3 = por %p77_p2, %p76_p1 }
   0x8   :  { %p79_p4 = pnand %p78_p3, %p72_p0 }
   0xa   :  { %82 = shalt.err (!%p79_p4)
}
   0xb   :  { %20 = dma.hbm_to_vmem [thread:$0]  %s136_s1, 256, %s18_s10, [#allocation3]  }
   0xc   :  { %103 = dma.done.wait [#allocation3], 256  }
   0xd   :  { %104 = vsyncadd [#allocation3], 4294967040  ;;  %v108_v0 = vmov 0   ;;  %v26_v1 = vld [vmem:[%s135_s0] sm:$0x3]  ;;  %v34_v4 = vlaneseq  ;;  %v25_v10 = vld [vmem:[#allocation2 + $0x8] sm:$0xff] }
   0xe   :  { %62 = vset.pattern.permute.xlu0 %v108_v0  ;;  %v109_v2 = vmov 269488144   ;;  %v24_v9 = vld [vmem:[#allocation2] sm:$0xff]  ;;  %s110_s16 = smov [#allocation5]  }
   0xf   :  { %29 = vperm.xlu0 %62, %v26_v1   ;;  %v32_v3 = vunpack.c.l.s4 %v109_v2  ;;  %v35_v6 = vshrl.u32 %v34_v4, 7  ;;  %s49_s1 = sshll.u32 %s110_s16, 4  ;;  %s50_s1 = int_to_ptr.vmem [resolvable:$true] %s49_s1 }
  0x10   :  { %s83_s17 = scalar_lea.vmem %s50_s1, 256  ;;  %p88_p6 = scmp.lt.s32.totalorder %s50_s1, %s50_s1 }
  0x11   :  { %v33_v5 = vunpack.c.0.s8 %v32_v3  ;;  %p84_p5 = scmp.ne.s32.totalorder %s50_s1, %s83_s17  ;;  %p89_p7 = scmp.lt.s32.totalorder %s83_s17, %s83_s17 }
  0x13   :  { %v36_v7 = vsub.s32 %v33_v5, %v35_v6  ;;  %p90_p8 = por %p89_p7, %p88_p6 }
  0x15   :  { %p91_p9 = pnand %p90_p8, %p84_p5 }
  0x8a   :  { %v30_v8 = vpop.permute.xlu0 %29 }
  0x8b   :  { %v37_v11 = vrot.slane %v30_v8, %v36_v7 }
  0x8d   :  { %v39_v12 = vmul.f32 %v37_v11, %v24_v9  ;;  %v40_v13 = vmul.f32 %v37_v11, %v25_v10 }
  0x8f   :  { %41 = vst [vmem:[#allocation5] sm:$0xff] %v39_v12  ;;  %42 = vst [vmem:[#allocation5 + $0x8] sm:$0xff] %v40_v13 }
  0x90   :  { %94 = shalt.err (!%p91_p9)
}
  0x91   :  { %52 = dma.vmem_to_hbm [thread:$0]  %s50_s1, 256, %s137_s2, [#allocation4]  }
  0x92   :  { %105 = dma.done.wait [#allocation4], 256  }
  0x93   :  { %106 = vsyncadd [#allocation4], 4294967040 }
  0x94   :  { %56 = vsyncpa [#allocation3], 1 }
  0x95   :  { %57 = vsyncpa [#allocation4], 1 }

</bundles_post_ra>
